<compile_context>
chip_gen: v7x
topology: tpu7x:2x2x1
jax: 0.10.0
libtpu: 0.0.40
codegen_flags: <defaults>
</compile_context>

<pallas_src>
import functools

import jax
import jax.numpy as jnp
from jax.experimental import pallas as pl
from jax.experimental.pallas import tpu as pltpu

_LANES = 128


def _vmem_budgets():
    """(vmem_limit_bytes, per-buffer input-slab budget) keyed on generation."""
    cap = 64 * 1024 * 1024  # conservative default (v7x: 64 MiB per TC)
    try:
        info = pltpu.get_tpu_info()
        cap = int(getattr(info, "vmem_capacity_bytes", cap))
    except Exception:
        pass
    if cap >= 128 * 1024 * 1024:      # v5e / v6e: 128 MiB VMEM
        return 64 * 1024 * 1024, 20 * 1024 * 1024
    return 48 * 1024 * 1024, 16 * 1024 * 1024   # v7x: 64 MiB physical


def _row_sum(x_ref, acc_dtype):
    """Row-sum of a (block_b, F) VMEM tile -> (block_b,) in acc_dtype.

    Each 128-lane chunk is cross-lane reduced immediately and accumulated
    into a (block_b, 1) column, so the only persistent temp is block_b x 1
    (no (block_b, F)-sized conversion copy).
    """
    _, F = x_ref.shape
    n_chunks = pl.cdiv(F, _LANES)
    if n_chunks <= 1:
        return jnp.sum(x_ref[...].astype(acc_dtype), axis=1)
    acc = jnp.sum(x_ref[:, 0:_LANES].astype(acc_dtype), axis=1, keepdims=True)
    for c in range(1, n_chunks):
        lo = c * _LANES
        hi = min(F, lo + _LANES)
        acc = acc + jnp.sum(
            x_ref[:, lo:hi].astype(acc_dtype), axis=1, keepdims=True)
    return acc[:, 0]


def _lr_kernel_bias(bias_ref, x_ref, o_ref, *, acc_dtype):
    # bias_ref: (1,) SMEM f32 scalar; x_ref: (block_b, F); o_ref: (1, block_b).
    s = _row_sum(x_ref, acc_dtype)
    s = s + bias_ref[0].astype(s.dtype)
    o_ref[0, :] = s.astype(o_ref.dtype)


def _lr_kernel_nobias(x_ref, o_ref, *, acc_dtype):
    o_ref[0, :] = _row_sum(x_ref, acc_dtype).astype(o_ref.dtype)


def _pick_block_b(B, F, itemsize, buf_budget):
    """Batch-tile rows: VMEM-budgeted, lane-aligned, >=4 grid steps for big B."""
    if B <= _LANES:
        return B  # single full block; full-dim exemption from tiling rules
    f_pad = pl.cdiv(F, _LANES) * _LANES        # lane dim pads to 128
    bytes_per_row = max(1, f_pad * itemsize)
    # Packed-sublane minimum rows: 8 (f32), 16 (bf16), 32 (int8).
    sub_align = 8 * max(1, 4 // max(1, itemsize))
    rows_budget = max(sub_align, buf_budget // bytes_per_row)
    # Target >=4 grid steps for large B (>=2 per TensorCore on v7x), but never
    # shrink below one 128-row lane group when the budget allows it.
    rows_target = max(_LANES, pl.cdiv(pl.cdiv(B, 4), _LANES) * _LANES)
    block_b = min(rows_budget, rows_target)
    if block_b >= _LANES:
        block_b = (block_b // _LANES) * _LANES
    else:
        # Wide-F guard: even 128 rows would blow the buffer budget; fall back
        # to the packed-sublane minimum alignment (output stays full-lane-dim).
        block_b = max(sub_align, (block_b // sub_align) * sub_align)
    # Best-effort even grid count so the two v7x cores stay balanced.
    grid = pl.cdiv(B, block_b)
    if grid > 1 and grid % 2 == 1:
        align = _LANES if block_b >= _LANES else sub_align
        cand = pl.cdiv(pl.cdiv(B, grid + 1), align) * align
        if align <= cand <= rows_budget and pl.cdiv(B, cand) % 2 == 0:
            block_b = cand
    # TODO(synk): add an F-tiling "arbitrary" grid axis with a pl.when
    # accumulator for F so wide that even `sub_align` rows exceed the budget.
    return block_b


def lr_layer(x, bias=None, block_b=None):
    """Pallas LRLayer.forward for 2-D input (B, F): x.sum(axis=1) (+ bias)."""
    B, F = x.shape
    itemsize = jnp.dtype(x.dtype).itemsize
    vmem_limit, buf_budget = _vmem_budgets()
    if block_b is None:
        block_b = _pick_block_b(B, F, itemsize, buf_budget)

    if jnp.issubdtype(x.dtype, jnp.floating):
        acc_dtype = jnp.float32
        out_dtype = x.dtype
    else:
        # TODO(synk): torch promotes integer .sum(dim=1) to int64; int32 is
        # used here (TPU has no vector int64). Exact for int8/int16 inputs.
        acc_dtype = jnp.int32
        out_dtype = jnp.int32

    grid_b = pl.cdiv(B, block_b)
    b_pad = grid_b * block_b
    if b_pad != B:
        # Zero rows only contribute to output rows that are sliced off below.
        x = jnp.pad(x, ((0, b_pad - B), (0, 0)))

    x_spec = pl.BlockSpec((block_b, F), lambda i: (i, 0))
    # Lane-dense output: one (1, block_b) row per grid step; flattening the
    # (grid_b, block_b) slab afterwards is a free row-major view.
    o_spec = pl.BlockSpec((1, block_b), lambda i: (i, 0))
    out_shape = jax.ShapeDtypeStruct((grid_b, block_b), out_dtype)
    compiler_params = pltpu.CompilerParams(
        dimension_semantics=("parallel",),
        vmem_limit_bytes=vmem_limit,
    )

    if bias is not None:
        bias = jnp.asarray(bias, dtype=jnp.float32).reshape((1,))
        out2d = pl.pallas_call(
            functools.partial(_lr_kernel_bias, acc_dtype=acc_dtype),
            out_shape=out_shape,
            grid_spec=pl.GridSpec(
                grid=(grid_b,),
                in_specs=[
                    pl.BlockSpec(memory_space=pltpu.MemorySpace.SMEM),  # bias
                    x_spec,
                ],
                out_specs=o_spec,
            ),
            compiler_params=compiler_params,
        )(bias, x)
    else:
        out2d = pl.pallas_call(
            functools.partial(_lr_kernel_nobias, acc_dtype=acc_dtype),
            out_shape=out_shape,
            grid_spec=pl.GridSpec(
                grid=(grid_b,),
                in_specs=[x_spec],
                out_specs=o_spec,
            ),
            compiler_params=compiler_params,
        )(x)

    out = out2d.reshape(b_pad)
    if b_pad != B:
        out = out[:B]
    return out  # matches torch .sum(dim=1) (+ bias) for 2-D input


if __name__ == "__main__":
    key = jax.random.PRNGKey(0)
    k1, k2, k3 = jax.random.split(key, 3)

    # Small demo shape consistent with an LR layer over field inputs.
    B, F = 8, 32
    x = jax.random.normal(key, (B, F), dtype=jnp.float32)
    bias = jnp.zeros((1,), dtype=jnp.float32)  # nn.Parameter(torch.zeros(1))
    out = jax.block_until_ready(lr_layer(x, bias))
    ref = x.sum(axis=1) + bias[0]
    assert out.shape == (B,)
    assert jnp.allclose(out, ref, atol=1e-5, rtol=1e-5)

    # Tiled path: multi-block grid + per-chunk lane-reduction accumulation.
    B2, F2 = 384, 384
    x2 = jax.random.normal(k1, (B2, F2), dtype=jnp.float32)
    b2 = jax.random.normal(k2, (1,), dtype=jnp.float32)
    out2 = jax.block_until_ready(lr_layer(x2, b2, block_b=128))
    ref2 = x2.sum(axis=1) + b2[0]
    assert out2.shape == (B2,)
    assert jnp.allclose(out2, ref2, atol=1e-4, rtol=1e-4)

    # Batch padding (B % block_b != 0) and the no-bias path.
    B3, F3 = 200, 32
    x3 = jax.random.normal(k2, (B3, F3), dtype=jnp.float32)
    out3 = jax.block_until_ready(lr_layer(x3, bias=None, block_b=128))
    ref3 = x3.sum(axis=1)
    assert out3.shape == (B3,)
    assert jnp.allclose(out3, ref3, atol=1e-5, rtol=1e-5)

    # bf16 input: accumulate in f32, round once to bf16 at the end.
    B4, F4 = 256, 256
    x4 = jax.random.normal(k3, (B4, F4), dtype=jnp.float32).astype(jnp.bfloat16)
    out4 = jax.block_until_ready(lr_layer(x4, bias=None, block_b=128))
    ref4 = x4.astype(jnp.float32).sum(axis=1)
    assert out4.shape == (B4,)
    assert jnp.allclose(out4.astype(jnp.float32), ref4, atol=0.5, rtol=2e-2)

    # Integer input: exact int32 accumulation / int32 output.
    B5, F5 = 64, 16
    x5 = jax.random.randint(k1, (B5, F5), -5, 6, dtype=jnp.int32)
    out5 = jax.block_until_ready(lr_layer(x5, bias=None))
    ref5 = x5.sum(axis=1).astype(jnp.int32)
    assert out5.dtype == jnp.int32 and out5.shape == (B5,)
    assert jnp.array_equal(out5, ref5)

    print("KERNEL_OK")
</pallas_src>

<mosaic_0001>
module attributes {stable_mosaic.version = 11 : i64} {
  func.func @_lr_kernel_bias(%arg0: i32, %arg1: memref<1xf32, #tpu.memory_space<smem>>, %arg2: memref<8x32xf32, #tpu.memory_space<vmem>>, %arg3: memref<1x8xf32, #tpu.memory_space<vmem>>) attributes {dimension_semantics = [#tpu.dimension_semantics<parallel>], iteration_bounds = array<i64: 1>, scalar_prefetch = 0 : i64, scratch_operands = 0 : i64, tpu.core_type = #tpu.core_type<tc>, window_params = [{transform_indices = @transform_0, window_bounds = array<i64: 1>}, {transform_indices = @transform_1, window_bounds = array<i64: 8, 32>}, {transform_indices = @transform_2, window_bounds = array<i64: 1, 8>}]} {
    %c0 = arith.constant 0 : index
    %c0_0 = arith.constant 0 : index
    %0 = vector.load %arg2[%c0, %c0_0] : memref<8x32xf32, #tpu.memory_space<vmem>>, vector<8x32xf32>
    %cst = arith.constant dense<0.000000e+00> : vector<8xf32>
    %1 = vector.multi_reduction <add>, %0, %cst [1] : vector<8x32xf32> to vector<8xf32>
    %c0_1 = arith.constant 0 : index
    %2 = memref.load %arg1[%c0_1] : memref<1xf32, #tpu.memory_space<smem>>
    %3 = vector.broadcast %2 : f32 to vector<8xf32>
    %4 = arith.addf %1, %3 : vector<8xf32>
    %c0_2 = arith.constant 0 : index
    %c0_3 = arith.constant 0 : index
    %5 = vector.load %arg3[%c0_2, %c0_3] : memref<1x8xf32, #tpu.memory_space<vmem>>, vector<1x8xf32>
    %6 = vector.shape_cast %5 : vector<1x8xf32> to vector<8xf32>
    %7 = vector.shape_cast %4 : vector<8xf32> to vector<1x8xf32>
    tpu.vector_store %arg3[%c0_2, %c0_3], %7 {strides = array<i32>} : memref<1x8xf32, #tpu.memory_space<vmem>>, vector<1x8xf32>,
    return
  }
  func.func @transform_0(%arg0: i32) -> i32 {
    %c0_i32 = arith.constant 0 : i32
    %c0_i32_0 = arith.constant 0 : i32
    return %c0_i32 : i32
  }
  func.func @transform_1(%arg0: i32) -> (i32, i32) {
    %c0_i32 = arith.constant 0 : i32
    %c0_i32_0 = arith.constant 0 : i32
    return %arg0, %c0_i32 : i32, i32
  }
  func.func @transform_2(%arg0: i32) -> (i32, i32) {
    %c0_i32 = arith.constant 0 : i32
    %c0_i32_0 = arith.constant 0 : i32
    return %arg0, %c0_i32 : i32, i32
  }
}

</mosaic_0001>

<bundles_post_ra>
// kernel: tpu_custom_call.1
= control target key start
LH: loop header
LB: loop body
LE: loop exit
PB: predicated region body
PF: predicated region fallthrough
CT: control target
= control target key end

     0   :  { %8 = vsyncpa [#allocation4], 0  ;;  %s152_s0 = inlined_call_operand.<no memory space> [shape: f32[1], index: 0, kind: input, shape index: {}]   ;;  %s153_s1 = inlined_call_operand.hbm [shape: f32[8,32], index: 1, kind: input, shape index: {}]   ;;  %s154_s2 = inlined_call_operand.hbm [shape: f32[1,8], index: 2, kind: output, shape index: {}]  }
   0x1   :  { %9 = vsyncpa [#allocation5], 0  ;;  %s108_s9 = smov [#allocation3]   ;;  %s60_s13 = scalar_lea.hbm %s153_s1, 128 }
   0x2   :  { %s18_s10 = sshll.u32 %s108_s9, 4  ;;  %p61_p0 = scmp.ne.s32.totalorder %s153_s1, %s60_s13  ;;  %s19_s10 = int_to_ptr.vmem [resolvable:$true] %s18_s10 }
   0x3   :  { %p64_p1 = scmp.lt.u32.totalorder %s60_s13, %s153_s1 }
   0x5   :  { %p66_p2 = pnand %p64_p1, %p61_p0 }
   0x7   :  { %69 = shalt.err (!%p66_p2)
}
   0x8   :  { %s70_s18 = scalar_lea.vmem %s19_s10, 128  ;;  %p75_p4 = scmp.lt.s32.totalorder %s19_s10, %s19_s10 }
   0x9   :  { %p71_p3 = scmp.ne.s32.totalorder %s19_s10, %s70_s18  ;;  %p76_p5 = scmp.lt.s32.totalorder %s70_s18, %s70_s18 }
   0xb   :  { %p77_p6 = por %p76_p5, %p75_p4 }
   0xd   :  { %p78_p7 = pnand %p77_p6, %p71_p3 }
   0xf   :  { %81 = shalt.err (!%p78_p7)
}
  0x10   :  { %21 = dma.hbm_to_vmem [thread:$0]  %s153_s1, 128, %s19_s10, [#allocation4]  }
  0x11   :  { %104 = dma.done.wait [#allocation4], 128  }
  0x12   :  { %105 = vsyncadd [#allocation4], 4294967168  ;;  %vm26_vm0 = vcmask 261120   ;;  %v25_v0 = vld [vmem:[#allocation3] sm:$0xff]  ;;  %v34_v2 = vlaneseq  ;;  %v31_v5 = vstv %s152_s0  ;;  %s109_s23 = smov [#allocation6]   ;;  %vm41_vm1 = vcmask 57344  }
  0x13   :  { %v27_v1 = vsel %vm26_vm0, %v25_v0, 0.0  ;;  %s49_s24 = sshll.u32 %s109_s23, 4  ;;  %s50_s24 = int_to_ptr.vmem [resolvable:$true] %s49_s24 }
  0x14   :  { %28 = vadd.xlane.f32.xlu0 %v27_v1  ;;  %v35_v3 = vand.u32 127, %v34_v2  ;;  %v37_v4 = vshrl.u32 %v34_v2, 7  ;;  %s82_s1 = scalar_lea.vmem %s50_s24, 16  ;;  %s86_s25 = scalar_lea.vmem %s50_s24, 32 }
  0x15   :  { %p83_p8 = scmp.ne.s32.totalorder %s50_s24, %s82_s1  ;;  %p87_p9 = scmp.lt.s32.totalorder %s50_s24, %s50_s24 }
  0x16   :  { %v38_v6 = vsub.s32 %v35_v3, %v37_v4  ;;  %p88_p10 = scmp.lt.s32.totalorder %s86_s25, %s82_s1 }
  0x18   :  { %p89_p11 = por %p88_p10, %p87_p9 }
  0x1a   :  { %p90_p12 = pnand %p89_p11, %p83_p8 }
  0xa1   :  { %v29_v7 = vpop.xlane.xlu0 %28 }
  0xa2   :  { %v32_v8 = vadd.f32 %v31_v5, %v29_v7 }
  0xa4   :  { %v39_v9 = vrot.slane %v32_v8, %v38_v6 }
  0xa6   :  { %42 = vst.msk [vmem:[#allocation6] sm:$0x1] %vm41_vm1, %v39_v9 }
  0xa7   :  { %93 = shalt.err (!%p90_p12)
}
  0xa8   :  { %s94_s0 = scalar_lea.hbm %s154_s2, 16 }
  0xa9   :  { %p95_p13 = scmp.ne.s32.totalorder %s154_s2, %s94_s0  ;;  %p98_p0 = scmp.lt.u32.totalorder %s94_s0, %s154_s2 }
  0xab   :  { %p100_p1 = pnand %p98_p0, %p95_p13 }
  0xad   :  { %103 = shalt.err (!%p100_p1)
}
  0xae   :  { %52 = dma.vmem_to_hbm [thread:$0]  %s50_s24, 16, %s154_s2, [#allocation5]  }
  0xaf   :  { %106 = dma.done.wait [#allocation5], 16  }
  0xb0   :  { %107 = vsyncadd [#allocation5], 4294967280 }
  0xb1   :  { %56 = vsyncpa [#allocation4], 1 }
  0xb2   :  { %57 = vsyncpa [#allocation5], 1 }

</bundles_post_ra>
